<compile_context>
chip_gen: v5e
topology: v5e:2x2
jax: 0.10.0
libtpu: 0.0.40
codegen_flags: <defaults>
</compile_context>

<pallas_src>
import math

import jax
import jax.numpy as jnp
from jax.experimental import pallas as pl
from jax.experimental.pallas import tpu as pltpu


def _bellmf_kernel(x_ref, p_ref, o_ref):
    # x_ref: (TR, K)  un-expanded inputs
    # p_ref: (3, W)   [1/a ; b ; c], pre-tiled to the output lane width
    # o_ref: (TR, W)  with W == K * M
    tr, k = x_ref.shape
    w = o_ref.shape[-1]
    m = w // k

    x = x_ref[...].astype(jnp.float32)                 # (TR, K)
    p = p_ref[...].astype(jnp.float32)                 # (3, W)
    inv_a, bb, cc = p[0:1, :], p[1:2, :], p[2:3, :]    # (1, W) each

    # Interleave-repeat x along the lane axis by factor M: xe[:, j] = x[:, j//M].
    # Broadcast + minor-dim-merge reshape; at worst this materializes a VMEM
    # relayout, which is cheap relative to the HBM-bound streaming cost.
    xe = jnp.broadcast_to(x[:, :, None], (tr, k, m)).reshape(tr, w)

    base = jnp.abs((xe - cc) * inv_a)                  # |(x - c) / a|

    # 1/(1 + base**(2b)) == sigmoid(-2b*log base) == 0.5 - 0.5*tanh(b*log base)
    # -> only 2 EUP pushes (log + tanh); keep this form (exp+recip would be 3).
    t = bb * jnp.log(base)
    # b == 0  ->  base**0 == 1  ->  out == 0.5 exactly (also guards the
    # 0 * log(0) = NaN corner when x == c, matching torch's 0**0 == 1).
    t = jnp.where(bb == 0.0, 0.0, t)
    out = 0.5 - 0.5 * jnp.tanh(t)
    o_ref[...] = out.astype(o_ref.dtype)


def _round_up(v, n):
    return -(-v // n) * n


def _sublane_multiple(dtype):
    # 8 for f32, 16 for bf16, 32 for int8/fp8 (sublane packing alignment).
    return max(8, 32 // jnp.dtype(dtype).itemsize)


def _pick_rows_tile(rows, x_width, out_width, x_itemsize, out_itemsize, *,
                    sublane,
                    target_out_tile_bytes=2 * 1024 * 1024,
                    vmem_budget_bytes=12 * 1024 * 1024,
                    min_grid_steps=8):
    """Rows per block: sized from *padded* VMEM bytes (128-lane tiles), counting
    the x tile, the out tile and double buffering, under the tightest default
    scoped-VMEM limit (16 MiB v5e); also keeps >= min_grid_steps grid steps so
    the 'parallel' axis can shard across v7x's two TensorCores."""
    xw_pad = _round_up(x_width, 128)
    ow_pad = _round_up(out_width, 128)
    bytes_per_row = xw_pad * x_itemsize + ow_pad * out_itemsize
    by_budget = vmem_budget_bytes // max(2 * bytes_per_row, 1)   # 2 = double buffer
    by_target = target_out_tile_bytes // max(ow_pad * out_itemsize, 1)
    rt = max(sublane, min(by_budget, by_target))
    rt = min(rt, max(sublane, _round_up(pl.cdiv(rows, min_grid_steps), sublane)))
    rt = min(rt, rows)
    if rt < rows:
        rt = max(sublane, (rt // sublane) * sublane)
    return int(rt)


def bellmf_pallas(x, a, b, c, *, rows_tile=None, fold_lanes=True):
    B, F = x.shape
    Fa, M = a.shape
    assert Fa == F and b.shape == (F, M) and c.shape == (F, M)
    FM = F * M
    out_dtype = x.dtype

    # Host-side parameter prep (tiny, done once / constant-folded under jit):
    # 1/a removes the per-element divide; stack into ONE grid-invariant operand.
    inv_a = 1.0 / a.astype(jnp.float32)
    params = jnp.stack(
        [inv_a, b.astype(jnp.float32), c.astype(jnp.float32)], axis=0
    ).reshape(3, FM)                                           # (3, F*M)

    # Lane folding: fold `fold` consecutive batch rows into one kernel row so
    # the output lane width is a multiple of 128 (dense, unmasked stores).
    fold = 1
    if fold_lanes and FM % 128 != 0:
        L = 128 // math.gcd(FM, 128)
        if B % L == 0:
            fold = L
    # NOTE: when B is not divisible by the fold factor we fall back to the
    # (B, F*M) layout (correct, repeat-free, just lane-padded for tiny F*M).

    rows = B // fold
    x_width = fold * F                 # kernel x lane width
    out_width = fold * FM              # kernel out lane width (128-multiple if folded)

    x2 = x.reshape(rows, x_width)                              # free reshape
    p2 = jnp.tile(params, (1, fold)) if fold > 1 else params   # (3, out_width)

    if rows_tile is None:
        rows_tile = _pick_rows_tile(
            rows, x_width, out_width,
            jnp.dtype(x.dtype).itemsize, jnp.dtype(out_dtype).itemsize,
            sublane=_sublane_multiple(out_dtype))
    rows_tile = max(1, min(int(rows_tile), rows))
    grid = (pl.cdiv(rows, rows_tile),)

    cost = pl.CostEstimate(
        flops=7 * B * FM,
        transcendentals=2 * B * FM,
        bytes_accessed=int(B * F * jnp.dtype(x.dtype).itemsize
                           + B * FM * jnp.dtype(out_dtype).itemsize
                           + 3 * out_width * 4),
    )

    out_flat = pl.pallas_call(
        _bellmf_kernel,
        out_shape=jax.ShapeDtypeStruct((rows, out_width), out_dtype),
        grid_spec=pltpu.PrefetchScalarGridSpec(
            num_scalar_prefetch=0,
            grid=grid,
            in_specs=[
                pl.BlockSpec((rows_tile, x_width), lambda i: (i, 0)),  # x (un-expanded)
                pl.BlockSpec((3, out_width), lambda i: (0, 0)),        # params (grid-invariant)
            ],
            out_specs=pl.BlockSpec((rows_tile, out_width), lambda i: (i, 0)),
        ),
        compiler_params=pltpu.CompilerParams(
            dimension_semantics=("parallel",),
            # Tiles fit the default scoped VMEM on every generation (16 MiB
            # v5e / 32 MiB v6e,v7x). For very long batches on v6e, raising
            # vmem_limit_bytes + target_out_tile_bytes buys a few more % of
            # the HBM roofline.
        ),
        cost_estimate=cost,
    )(x2, p2)

    # Free reshape: (rows, out_width) and (B, F, M) share the same C-order memory.
    return out_flat.reshape(B, F, M)


def bellmf_reference(x, a, b, c):
    x_expanded = x[:, :, None].astype(jnp.float32)
    return 1.0 / (1.0 + jnp.abs((x_expanded - c[None]) / a[None]) ** (2.0 * b[None]))


if __name__ == "__main__":
    in_features = 4
    mf_per_input = 3

    key = jax.random.PRNGKey(0)

    # BellMF.__init__-equivalent deterministic parameters.
    a = jnp.ones((in_features, mf_per_input), jnp.float32)
    b = jnp.ones((in_features, mf_per_input), jnp.float32)
    c = jnp.tile(jnp.linspace(0.0, 1.0, mf_per_input, dtype=jnp.float32),
                 (in_features, 1))

    # 1) Tiny batch -> per-batch-row fallback layout, single grid step.
    x1 = jax.random.normal(key, (8, in_features), jnp.float32)
    o1 = jax.block_until_ready(bellmf_pallas(x1, a, b, c))
    r1 = bellmf_reference(x1, a, b, c)
    assert o1.shape == (8, in_features, mf_per_input)
    assert jnp.allclose(o1, r1, atol=1e-5, rtol=1e-5)

    # 2) Batch divisible by the fold factor (L=32 for F*M=12) -> lane-dense
    #    folded layout (W=384), multi-step grid with a partial final block.
    x2 = jax.random.normal(jax.random.PRNGKey(1), (320, in_features), jnp.float32)
    o2 = jax.block_until_ready(bellmf_pallas(x2, a, b, c))
    r2 = bellmf_reference(x2, a, b, c)
    assert o2.shape == (320, in_features, mf_per_input)
    assert jnp.allclose(o2, r2, atol=1e-5, rtol=1e-5)

    # 3) Odd F*M with non-trivial params, batch not divisible by the fold
    #    factor -> fallback layout with a 2-step grid.
    F3, M3 = 5, 7
    a3 = 0.5 + jax.random.uniform(jax.random.PRNGKey(2), (F3, M3), jnp.float32)
    b3 = 0.5 + jax.random.uniform(jax.random.PRNGKey(3), (F3, M3), jnp.float32)
    c3 = jax.random.normal(jax.random.PRNGKey(4), (F3, M3), jnp.float32)
    x3 = jax.random.normal(jax.random.PRNGKey(5), (16, F3), jnp.float32)
    o3 = jax.block_until_ready(bellmf_pallas(x3, a3, b3, c3))
    r3 = bellmf_reference(x3, a3, b3, c3)
    assert jnp.allclose(o3, r3, atol=1e-5, rtol=1e-5)

    print("KERNEL_OK")
</pallas_src>

<mosaic_0001>
module attributes {stable_mosaic.version = 11 : i64} {
  func.func @_bellmf_kernel(%arg0: i32, %arg1: memref<8x4xf32, #tpu.memory_space<vmem>>, %arg2: memref<3x12xf32, #tpu.memory_space<vmem>>, %arg3: memref<8x12xf32, #tpu.memory_space<vmem>>) attributes {dimension_semantics = [#tpu.dimension_semantics<parallel>], iteration_bounds = array<i64: 1>, scalar_prefetch = 0 : i64, scratch_operands = 0 : i64, tpu.core_type = #tpu.core_type<tc>, window_params = [{transform_indices = @transform_0, window_bounds = array<i64: 8, 4>}, {pipeline_mode = #tpu.pipeline_mode<synchronous>, transform_indices = @transform_1, window_bounds = array<i64: 3, 12>}, {transform_indices = @transform_2, window_bounds = array<i64: 8, 12>}]} {
    %c0 = arith.constant 0 : index
    %c0_0 = arith.constant 0 : index
    %0 = vector.load %arg1[%c0, %c0_0] : memref<8x4xf32, #tpu.memory_space<vmem>>, vector<8x4xf32>
    %c0_1 = arith.constant 0 : index
    %c0_2 = arith.constant 0 : index
    %1 = vector.load %arg2[%c0_1, %c0_2] : memref<3x12xf32, #tpu.memory_space<vmem>>, vector<3x12xf32>
    %2 = vector.extract_strided_slice %1 {offsets = [0, 0], sizes = [1, 12], strides = [1, 1]} : vector<3x12xf32> to vector<1x12xf32>
    %3 = vector.extract_strided_slice %1 {offsets = [1, 0], sizes = [1, 12], strides = [1, 1]} : vector<3x12xf32> to vector<1x12xf32>
    %4 = vector.extract_strided_slice %1 {offsets = [2, 0], sizes = [1, 12], strides = [1, 1]} : vector<3x12xf32> to vector<1x12xf32>
    %5 = vector.shape_cast %0 : vector<8x4xf32> to vector<8x4x1xf32>
    %6 = vector.shape_cast %5 : vector<8x4x1xf32> to vector<8x4x1xf32>
    %7 = vector.broadcast %6 : vector<8x4x1xf32> to vector<8x4x3xf32>
    %8 = vector.shape_cast %7 : vector<8x4x3xf32> to vector<8x12xf32>
    %9 = vector.broadcast %4 : vector<1x12xf32> to vector<8x12xf32>
    %10 = arith.subf %8, %9 : vector<8x12xf32>
    %11 = vector.broadcast %2 : vector<1x12xf32> to vector<8x12xf32>
    %12 = arith.mulf %10, %11 : vector<8x12xf32>
    %13 = math.absf %12 : vector<8x12xf32>
    %14 = math.log %13 : vector<8x12xf32>
    %15 = vector.broadcast %3 : vector<1x12xf32> to vector<8x12xf32>
    %16 = arith.mulf %15, %14 : vector<8x12xf32>
    %cst = arith.constant 0.000000e+00 : f32
    %17 = vector.broadcast %cst : f32 to vector<1x12xf32>
    %18 = arith.cmpf oeq, %3, %17 : vector<1x12xf32>
    %cst_3 = arith.constant 0.000000e+00 : f32
    %19 = vector.shape_cast %18 : vector<1x12xi1> to vector<1x12xi1>
    %20 = vector.broadcast %19 : vector<1x12xi1> to vector<8x12xi1>
    %21 = vector.broadcast %cst_3 : f32 to vector<8x12xf32>
    %22 = arith.select %20, %21, %16 : vector<8x12xi1>, vector<8x12xf32>
    %23 = math.tanh %22 : vector<8x12xf32>
    %cst_4 = arith.constant 5.000000e-01 : f32
    %24 = vector.broadcast %cst_4 : f32 to vector<8x12xf32>
    %25 = arith.mulf %24, %23 : vector<8x12xf32>
    %cst_5 = arith.constant 5.000000e-01 : f32
    %26 = vector.broadcast %cst_5 : f32 to vector<8x12xf32>
    %27 = arith.subf %26, %25 : vector<8x12xf32>
    %c0_6 = arith.constant 0 : index
    %c0_7 = arith.constant 0 : index
    %28 = vector.load %arg3[%c0_6, %c0_7] : memref<8x12xf32, #tpu.memory_space<vmem>>, vector<8x12xf32>
    tpu.vector_store %arg3[%c0_6, %c0_7], %27 {strides = array<i32>} : memref<8x12xf32, #tpu.memory_space<vmem>>, vector<8x12xf32>,
    return
  }
  func.func @transform_0(%arg0: i32) -> (i32, i32) {
    %c0_i32 = arith.constant 0 : i32
    %c0_i32_0 = arith.constant 0 : i32
    return %arg0, %c0_i32 : i32, i32
  }
  func.func @transform_1(%arg0: i32) -> (i32, i32) {
    %c0_i32 = arith.constant 0 : i32
    %c0_i32_0 = arith.constant 0 : i32
    %c0_i32_1 = arith.constant 0 : i32
    return %c0_i32, %c0_i32_0 : i32, i32
  }
  func.func @transform_2(%arg0: i32) -> (i32, i32) {
    %c0_i32 = arith.constant 0 : i32
    %c0_i32_0 = arith.constant 0 : i32
    return %arg0, %c0_i32 : i32, i32
  }
}

</mosaic_0001>

<bundles_post_ra>
// kernel: tpu_custom_call.1
= control target key start
LH: loop header
LB: loop body
LE: loop exit
PB: predicated region body
PF: predicated region fallthrough
CT: control target
= control target key end

     0   :  { %v15_v0 = vlaneseq  ;;  %s263_s0 = inlined_call_operand.vmem [shape: f32[8,4], index: 0, kind: input, shape index: {}]   ;;  %s264_s1 = inlined_call_operand.vmem [shape: f32[3,12], index: 1, kind: input, shape index: {}]   ;;  %s265_s2 = inlined_call_operand.hbm [shape: f32[8,12], index: 2, kind: output, shape index: {}]  }
   0x1   :  { %7 = vsyncpa [#allocation3], 0  ;;  %v12_v2 = vld [vmem:[%s263_s0] sm:$0xff]  ;;  %v220_v14 = vmov 1983009808   ;;  %vm71_vm0 = vcmask 1047556  }
   0x2   :  { %v16_v1 = vshrl.u32 %v15_v0, 7  ;;  %v35_v3 = vperm.slane %v12_v2, 3  ;;  %v21_v4 = vperm.slane %v12_v2, 1  ;;  %v63_v5 = vperm.slane %v12_v2, 7  ;;  %s222_s0 = smov 6   ;;  %s223_s11 = smov 3  }
   0x3   :  { %v56_v6 = vperm.slane %v12_v2, 6  ;;  %v28_v7 = vperm.slane %v12_v2, 2  ;;  %v42_v8 = vperm.slane %v12_v2, 4  ;;  %v49_v9 = vperm.slane %v12_v2, 5  ;;  %s224_s12 = smov 9   ;;  %s171_s18 = sshll.u32 %s265_s2, 4  ;;  %s172_s18 = int_to_ptr.hbm [resolvable:$true] %s171_s18 }
   0x4   :  { %188 = vset.pattern.permute.xlu1 %v16_v1  ;;  %187 = vset.pattern.permute.xlu0 %v16_v1  ;;  %v14_v10 = vperm.slane %v12_v2, 0  ;;  %v74_v15 = vunpack.c.l.s4 %v220_v14  ;;  %v221_v24 = vmov 1934713408   ;;  %vm139_vm1 = vcmask 23552   ;;  %v13_v58 = vld [vmem:[%s264_s1] sm:$0x7] }
   0x5   :  { %189 = vset.pattern.permute.xlu2 %v16_v1  ;;  %v100_v25 = vunpack.c.l.s4 %v221_v24  ;;  %vm141_vm2 = vcmask 48128   ;;  %vm143_vm3 = vcmask 72704   ;;  %v145_v61 = vperm.slane %v13_v58, 2  ;;  %s226_s1 = smov [#allocation2]  }
   0x6   :  { %v75_v20 = vunpack.c.0.s8 %v74_v15  ;;  %v147_v63 = vperm.slane %v13_v58, 0  ;;  %vm154_vm4 = vcmp.eq.f32.partialorder %v13_v58, 0.0  ;;  %s169_s15 = sshll.u32 %s226_s1, 4  ;;  %vm162_vm6 = vcmask 97280   ;;  %s170_s15 = int_to_ptr.vmem [resolvable:$true] %s169_s15 }
   0x7   :  { %v101_v34 = vunpack.c.0.s8 %v100_v25 }
   0xc   :  { %40 = vperm.xlu0 %187, %v35_v3   ;;  %26 = vperm.xlu1 %188, %v21_v4  }
   0xd   :  { %68 = vperm.xlu2 %189, %v63_v5   ;;  %v225_v5 = vmov 0  }
  0x14   :  { %61 = vperm.xlu0 %187, %v56_v6   ;;  %33 = vperm.xlu1 %188, %v28_v7   ;;  %v155_v6 = vsel %vm154_vm4, 1, %v225_v5 }
  0x15   :  { %47 = vperm.xlu2 %189, %v42_v8   ;;  %v156_v7 = vperm.slane %v155_v6, 1  ;;  %v152_v8 = vperm.slane %v13_v58, 1 }
  0x17   :  { %vm157_vm5 = vcmp.eq.s32.totalorder %v156_v7, 1 }
  0x1c   :  { %54 = vperm.xlu1 %188, %v49_v9   ;;  %19 = vperm.xlu0 %187, %v14_v10  }
  0x67   :  { %v69_v11 = vpop.permute.xlu2 %68 }
  0x68   :  { %v89_v28 = vrot.slane %v69_v11, 4 }
  0x6f   :  { %v48_v21 = vpop.permute.xlu2 %47 }
  0x7e   :  { %v41_v12 = vpop.permute.xlu0 %40  ;;  %v27_v13 = vpop.permute.xlu1 %26 }
  0x7f   :  { %v77_v16 = vrot.slane %v41_v12, 4 }
  0x81   :  { %v78_v22 = vsel %vm71_vm0, %v77_v16, %v27_v13 }
  0x82   :  { %v82_v26 = vperm.slane %v78_v22, %v75_v20 }
  0x84   :  { %v95_v35 = vrot.slane %v82_v26, 4 }
  0x86   :  { %v62_v17 = vpop.permute.xlu0 %61  ;;  %v34_v18 = vpop.permute.xlu1 %33 }
  0x87   :  { %v83_v19 = vrot.slane %v62_v17, 4  ;;  %v70_v29 = vrot.slane %v34_v18, 4 }
  0x89   :  { %v84_v23 = vsel %vm71_vm0, %v83_v19, %v48_v21 }
  0x8a   :  { %v88_v27 = vperm.slane %v84_v23, %v75_v20 }
  0x8c   :  { %v109_v36 = vrot.slane %v88_v27, 4 }
  0x8e   :  { %v55_v30 = vpop.permute.xlu1 %54  ;;  %v20_v31 = vpop.permute.xlu0 %19 }
  0x8f   :  { %v90_v32 = vsel %vm71_vm0, %v89_v28, %v55_v30  ;;  %v72_v33 = vsel %vm71_vm0, %v70_v29, %v20_v31 }
  0x90   :  { %v94_v37 = vperm.slane %v90_v32, %v75_v20  ;;  %v76_v38 = vperm.slane %v72_v33, %v75_v20 }
  0x92   :  { %v107_v39 = vrot.slane %v94_v37, 4  ;;  %v110_v40 = vsel %vm71_vm0, %v94_v37, %v109_v36  ;;  %v96_v41 = vsel %vm71_vm0, %v95_v35, %v76_v38  ;;  %v97_v42 = vrot.slane %v76_v38, 4 }
  0x93   :  { %v118_v43 = vperm.slane %v110_v40, %v101_v34  ;;  %v102_v44 = vperm.slane %v96_v41, %v101_v34 }
  0x94   :  { %v98_v45 = vsel %vm71_vm0, %v82_v26, %v97_v42  ;;  %v108_v46 = vsel %vm71_vm0, %v107_v39, %v88_v27 }
  0x95   :  { %v106_v47 = vperm.slane %v98_v45, %v101_v34  ;;  %v123_v48 = vrot.slane %v118_v43, 4  ;;  %v114_v49 = vperm.slane %v108_v46, %v101_v34  ;;  %v121_v50 = vrot.slane %v102_v44, 4 }
  0x97   :  { %v124_v51 = vsel %vm71_vm0, %v123_v48, %v106_v47  ;;  %v119_v52 = vrot.slane %v114_v49, 4  ;;  %v122_v53 = vsel %vm71_vm0, %v114_v49, %v121_v50  ;;  %v125_v54 = vrot.slane %v106_v47, 4 }
  0x98   :  { %132 = vrot.lane.b32.xlu0 %v124_v51, %s222_s0  ;;  %128 = vrot.lane.b32.xlu2 %v122_v53, %s223_s11 }
  0x99   :  { %v126_v55 = vsel %vm71_vm0, %v118_v43, %v125_v54  ;;  %v120_v56 = vsel %vm71_vm0, %v119_v52, %v102_v44 }
  0x9a   :  { %136 = vrot.lane.b32.xlu1 %v126_v55, %s224_s12 }
  0xf2   :  { %v129_v57 = vpop.permute.xlu2 %128 }
  0xf3   :  { %v140_v59 = vsel %vm139_vm1, %v120_v56, %v129_v57 }
 0x10a   :  { %v133_v60 = vpop.permute.xlu0 %132 }
 0x10b   :  { %v142_v62 = vsel %vm141_vm2, %v140_v59, %v133_v60 }
 0x10c   :  { %v137_v0 = vpop.permute.xlu1 %136 }
 0x10d   :  { %v144_v1 = vsel %vm143_vm3, %v142_v62, %v137_v0 }
 0x10e   :  { %v146_v2 = vsub.f32 %v144_v1, %v145_v61 }
 0x110   :  { %v148_v3 = vmul.f32 %v147_v63, %v146_v2 }
 0x112   :  { %v149_v4 = vand.u32 2147483647, %v148_v3 }
 0x114   :  { %190 = vlog2.f32 %v149_v4 }
 0x11a   :  { %v191_v9 = vpop.eup %190 }
 0x11b   :  { %v151_v10 = vmul.f32 0.6931472, %v191_v9 }
 0x11d   :  { %v153_v11 = vmul.f32 %v152_v8, %v151_v10 }
 0x11f   :  { %v158_v12 = vsel %vm157_vm5, 0.0, %v153_v11 }
 0x120   :  { %192 = vtanh.f32 %v158_v12 }
 0x126   :  { %v193_v13 = vpop.eup %192 }
 0x127   :  { %v160_v14 = vmul.f32 0.5, %v193_v13 }
 0x129   :  { %v161_v15 = vsub.f32 0.5, %v160_v14 }
 0x12b   :  { %163 = vst.msk [vmem:[#allocation2] sm:$0xff] %vm162_vm6, %v161_v15 }
 0x12c   :  { %174 = dma.vmem_to_hbm [thread:$0]  %s170_s15, 128, %s172_s18, [#allocation3]  }
 0x12d   :  { %218 = dma.done.wait [#allocation3], 128  }
 0x12e   :  { %219 = vsyncadd [#allocation3], 4294967168 }
 0x12f   :  { %179 = vsyncpa [#allocation3], 1 }

</bundles_post_ra>
